<compile_context>
chip_gen: v6e
topology: v6e:2x2x1
jax: 0.10.0
libtpu: 0.0.40
codegen_flags: <defaults>
</compile_context>

<pallas_src>
import jax
import jax.numpy as jnp
from jax.experimental import pallas as pl
from jax.experimental.pallas import tpu as pltpu


def _attention_kernel(x_ref, w_ref, bias_ref, out_ref):
    # x_ref:    (BT, S, F)  batch tile of rnn_output (native dtype)
    # w_ref:    (1, F)      attention_fc weight (row vector, f32)
    # bias_ref: (1, S)      positional bias with the fc bias folded in (f32)
    # out_ref:  (BT, F)     attended output tile
    x = x_ref[...].astype(jnp.float32)              # (BT, S, F)
    w = w_ref[...]                                  # (1, F)
    bias = bias_ref[...]                            # (1, S)

    # attention_fc(x): row-wise dot product along F (N=1 -> keep off the MXU).
    scores = jnp.sum(x * w, axis=-1) + bias         # (BT, S)

    aw = jnp.exp(jnp.tanh(scores))                  # (BT, S)   EUP ops
    denom = jnp.sum(aw, axis=-1, keepdims=True) + 1e-07   # (BT, 1)
    aw = aw / denom                                 # (BT, S)

    attended = jnp.sum(aw[:, :, None] * x, axis=1)  # (BT, F)
    out_ref[...] = attended.astype(out_ref.dtype)   # one lane/sublane-dense store


def _pick_b_tile(B, per_b_in_bytes, F):
    """Batch tile: ~1 MiB of input per grid step, double-buffered working set
    kept well under the smallest scoped-VMEM default across TPU generations."""
    budget = 12 * 1024 * 1024                        # safe on v5e/v6e/v7x
    per_b_vmem = 2 * per_b_in_bytes + 2 * F * 4      # dbl-buffered input + output
    bt_cap = max(1, budget // max(1, per_b_vmem))
    bt_target = max(8, (1 << 20) // max(1, per_b_in_bytes))
    bt = min(bt_cap, bt_target)
    if bt >= B:
        return B                                     # single full block (== array dim)
    return max(8, (bt // 8) * 8)                     # keep sublane-aligned output tiles


def attention_forward(rnn_output, fc_weight, fc_bias, pos_bias):
    """
    rnn_output: (B, S, F)            any float dtype (kept native; cast in-kernel)
    fc_weight:  (1, F)               nn.Linear(feature_dim, 1).weight
    fc_bias:    (1,)                 nn.Linear(feature_dim, 1).bias
    pos_bias:   (1, max_seq_len, 1)  self.bias parameter
    returns:    (B, F)               same dtype as rnn_output
    """
    B, S, F = rnn_output.shape
    assert pos_bias.shape[1] >= S, "seq_len exceeds max_seq_len of bias parameter"

    in_dtype = rnn_output.dtype
    itemsize = jnp.dtype(in_dtype).itemsize

    # Fold the scalar linear bias into the positional bias (both are added to
    # the same scores), giving a single (1, S) f32 bias vector.
    bias_s = (pos_bias[0, :S, 0].astype(jnp.float32)
              + fc_bias.astype(jnp.float32)[0]).reshape(1, S)
    w2d = fc_weight.reshape(1, F).astype(jnp.float32)

    bt = _pick_b_tile(B, S * F * itemsize, F)
    grid = (pl.cdiv(B, bt),)

    cost = pl.CostEstimate(
        flops=4 * B * S * F,                # dot along F + weighted sum along S
        transcendentals=2 * B * S,          # tanh + exp per score
        bytes_accessed=B * S * F * itemsize + B * F * itemsize + (S + F) * 4,
    )

    grid_spec = pltpu.PrefetchScalarGridSpec(
        num_scalar_prefetch=0,
        grid=grid,
        in_specs=[
            pl.BlockSpec((bt, S, F), lambda i: (i, 0, 0)),   # rnn_output tile
            pl.BlockSpec((1, F), lambda i: (0, 0)),          # fc weight
            pl.BlockSpec((1, S), lambda i: (0, 0)),          # folded bias
        ],
        out_specs=pl.BlockSpec((bt, F), lambda i: (i, 0)),
    )

    return pl.pallas_call(
        _attention_kernel,
        out_shape=jax.ShapeDtypeStruct((B, F), in_dtype),
        grid_spec=grid_spec,
        compiler_params=pltpu.CompilerParams(
            dimension_semantics=("parallel",),
            vmem_limit_bytes=32 * 1024 * 1024,
        ),
        cost_estimate=cost,
    )(rnn_output, w2d, bias_s)


def _reference(rnn_output, fc_weight, fc_bias, pos_bias):
    # Pure-JAX mirror of the PyTorch forward, for a sanity check.
    S = rnn_output.shape[1]
    x = rnn_output.astype(jnp.float32)
    aw = jnp.einsum("bsf,f->bs", x, fc_weight[0].astype(jnp.float32))[..., None]
    aw = aw + fc_bias.astype(jnp.float32)
    aw = aw + pos_bias[:, :S, :].astype(jnp.float32)
    aw = jnp.exp(jnp.tanh(aw))
    aw = aw / (jnp.sum(aw, axis=1, keepdims=True) + 1e-07)
    return jnp.sum(aw * x, axis=1).astype(rnn_output.dtype)


if __name__ == "__main__":
    feature_dim = 32
    max_seq_len = 70
    batch = 2
    seq_len = 8

    key = jax.random.PRNGKey(0)
    kx, kw, kb = jax.random.split(key, 3)

    # Deterministic "module init": nn.Linear(feature_dim, 1) uses
    # U(-1/sqrt(F), 1/sqrt(F)); self.bias is initialized to zeros.
    bound = 1.0 / jnp.sqrt(jnp.float32(feature_dim))
    fc_weight = jax.random.uniform(kw, (1, feature_dim), jnp.float32,
                                   minval=-bound, maxval=bound)
    fc_bias = jax.random.uniform(kb, (1,), jnp.float32,
                                 minval=-bound, maxval=bound)
    pos_bias = jnp.zeros((1, max_seq_len, 1), jnp.float32)

    rnn_output = jax.random.normal(kx, (batch, seq_len, feature_dim),
                                   jnp.float32)

    out = attention_forward(rnn_output, fc_weight, fc_bias, pos_bias)
    out = jax.block_until_ready(out)

    ref = _reference(rnn_output, fc_weight, fc_bias, pos_bias)
    assert out.shape == (batch, feature_dim)
    assert jnp.allclose(out, ref, atol=1e-5, rtol=1e-5)

    print("KERNEL_OK")
</pallas_src>

<mosaic_0001>
module attributes {stable_mosaic.version = 11 : i64} {
  func.func @_attention_kernel(%arg0: i32, %arg1: memref<2x8x32xf32, #tpu.memory_space<vmem>>, %arg2: memref<1x32xf32, #tpu.memory_space<vmem>>, %arg3: memref<1x8xf32, #tpu.memory_space<vmem>>, %arg4: memref<2x32xf32, #tpu.memory_space<vmem>>) attributes {dimension_semantics = [#tpu.dimension_semantics<parallel>], iteration_bounds = array<i64: 1>, scalar_prefetch = 0 : i64, scratch_operands = 0 : i64, tpu.core_type = #tpu.core_type<tc>, window_params = [{transform_indices = @transform_0, window_bounds = array<i64: 2, 8, 32>}, {pipeline_mode = #tpu.pipeline_mode<synchronous>, transform_indices = @transform_1, window_bounds = array<i64: 1, 32>}, {pipeline_mode = #tpu.pipeline_mode<synchronous>, transform_indices = @transform_2, window_bounds = array<i64: 1, 8>}, {transform_indices = @transform_3, window_bounds = array<i64: 2, 32>}]} {
    %c0 = arith.constant 0 : index
    %c0_0 = arith.constant 0 : index
    %c0_1 = arith.constant 0 : index
    %0 = vector.load %arg1[%c0, %c0_0, %c0_1] : memref<2x8x32xf32, #tpu.memory_space<vmem>>, vector<2x8x32xf32>
    %c0_2 = arith.constant 0 : index
    %c0_3 = arith.constant 0 : index
    %1 = vector.load %arg2[%c0_2, %c0_3] : memref<1x32xf32, #tpu.memory_space<vmem>>, vector<1x32xf32>
    %c0_4 = arith.constant 0 : index
    %c0_5 = arith.constant 0 : index
    %2 = vector.load %arg3[%c0_4, %c0_5] : memref<1x8xf32, #tpu.memory_space<vmem>>, vector<1x8xf32>
    %3 = vector.shape_cast %1 : vector<1x32xf32> to vector<1x1x32xf32>
    %4 = vector.broadcast %3 : vector<1x1x32xf32> to vector<2x8x32xf32>
    %5 = arith.mulf %0, %4 : vector<2x8x32xf32>
    %cst = arith.constant dense<0.000000e+00> : vector<2x8xf32>
    %6 = vector.multi_reduction <add>, %5, %cst [2] : vector<2x8x32xf32> to vector<2x8xf32>
    %7 = vector.broadcast %2 : vector<1x8xf32> to vector<2x8xf32>
    %8 = arith.addf %6, %7 : vector<2x8xf32>
    %9 = math.tanh %8 : vector<2x8xf32>
    %10 = math.exp %9 : vector<2x8xf32>
    %cst_6 = arith.constant dense<0.000000e+00> : vector<2xf32>
    %11 = vector.multi_reduction <add>, %10, %cst_6 [1] : vector<2x8xf32> to vector<2xf32>
    %12 = vector.shape_cast %11 : vector<2xf32> to vector<2x1xf32>
    %cst_7 = arith.constant 1.000000e-07 : f32
    %13 = vector.broadcast %cst_7 : f32 to vector<2x1xf32>
    %14 = arith.addf %12, %13 : vector<2x1xf32>
    %15 = vector.broadcast %14 : vector<2x1xf32> to vector<2x8xf32>
    %16 = arith.divf %10, %15 : vector<2x8xf32>
    %17 = vector.shape_cast %16 : vector<2x8xf32> to vector<2x8x1xf32>
    %18 = vector.broadcast %17 : vector<2x8x1xf32> to vector<2x8x32xf32>
    %19 = arith.mulf %18, %0 : vector<2x8x32xf32>
    %cst_8 = arith.constant dense<0.000000e+00> : vector<2x32xf32>
    %20 = vector.multi_reduction <add>, %19, %cst_8 [1] : vector<2x8x32xf32> to vector<2x32xf32>
    %c0_9 = arith.constant 0 : index
    %c0_10 = arith.constant 0 : index
    %21 = vector.load %arg4[%c0_9, %c0_10] : memref<2x32xf32, #tpu.memory_space<vmem>>, vector<2x32xf32>
    tpu.vector_store %arg4[%c0_9, %c0_10], %20 {strides = array<i32>} : memref<2x32xf32, #tpu.memory_space<vmem>>, vector<2x32xf32>,
    return
  }
  func.func @transform_0(%arg0: i32) -> (i32, i32, i32) {
    %c0_i32 = arith.constant 0 : i32
    %c0_i32_0 = arith.constant 0 : i32
    %c0_i32_1 = arith.constant 0 : i32
    return %arg0, %c0_i32, %c0_i32_0 : i32, i32, i32
  }
  func.func @transform_1(%arg0: i32) -> (i32, i32) {
    %c0_i32 = arith.constant 0 : i32
    %c0_i32_0 = arith.constant 0 : i32
    %c0_i32_1 = arith.constant 0 : i32
    return %c0_i32, %c0_i32_0 : i32, i32
  }
  func.func @transform_2(%arg0: i32) -> (i32, i32) {
    %c0_i32 = arith.constant 0 : i32
    %c0_i32_0 = arith.constant 0 : i32
    %c0_i32_1 = arith.constant 0 : i32
    return %c0_i32, %c0_i32_0 : i32, i32
  }
  func.func @transform_3(%arg0: i32) -> (i32, i32) {
    %c0_i32 = arith.constant 0 : i32
    %c0_i32_0 = arith.constant 0 : i32
    return %arg0, %c0_i32 : i32, i32
  }
}

</mosaic_0001>

<bundles_post_ra>
// kernel: tpu_custom_call.1
= control target key start
LH: loop header
LB: loop body
LE: loop exit
PB: predicated region body
PF: predicated region fallthrough
CT: control target
= control target key end

     0   :  { %8 = vsyncpa [#allocation3], 0  ;;  %s261_s0 = inlined_call_operand.hbm [shape: f32[2,8,32], index: 0, kind: input, shape index: {}]   ;;  %s262_s1 = inlined_call_operand.vmem [shape: f32[1,32], index: 1, kind: input, shape index: {}]   ;;  %s263_s2 = inlined_call_operand.vmem [shape: f32[1,8], index: 2, kind: input, shape index: {}]   ;;  %s264_s3 = inlined_call_operand.hbm [shape: f32[2,32], index: 3, kind: output, shape index: {}]  }
   0x1   :  { %9 = vsyncpa [#allocation4], 0  ;;  %s218_s12 = smov [#allocation2]  }
   0x2   :  { %s15_s13 = sshll.u32 %s218_s12, 4  ;;  %s16_s13 = int_to_ptr.vmem [resolvable:$true] %s15_s13 }
   0x3   :  { %s182_s14 = scalar_lea.vmem %s16_s13, 256  ;;  %p187_p1 = scmp.lt.s32.totalorder %s16_s13, %s16_s13 }
   0x4   :  { %p183_p0 = scmp.ne.s32.totalorder %s16_s13, %s182_s14  ;;  %p188_p2 = scmp.lt.s32.totalorder %s182_s14, %s182_s14 }
   0x6   :  { %p189_p3 = por %p188_p2, %p187_p1 }
   0x8   :  { %p190_p4 = pnand %p189_p3, %p183_p0 }
   0xa   :  { %193 = shalt.err (!%p190_p4)
}
   0xb   :  { %s219_s15 = smov 128   ;;  %s220_s16 = smov 8  }
   0xc   :  { %21 = dma.hbm_to_vmem [thread:$0]  %s261_s0, 256, %s16_s13, [#allocation3], %s219_s15, %s219_s15, %s220_s16  }
   0xd   :  { %214 = dma.done.wait [#allocation3], 256  }
   0xe   :  { %215 = vsyncadd [#allocation3], 4294967040  ;;  %v29_v0 = vld [vmem:[#allocation2] sm:$0xff]  ;;  %vm41_vm0 = vcmask 261120   ;;  %v30_v2 = vld [vmem:[#allocation2 + $0x8] sm:$0xff]  ;;  %v221_v8 = vmov 0   ;;  %v73_v20 = vlaneseq }
   0xf   :  { %v153_v1 = vld [vmem:[%s262_s1] ss:$0 sm:$0xff]  ;;  %160 = vset.pattern.permute.xlu1 %v221_v8  ;;  %161 = vset.pattern.permute.xlu0 %v221_v8  ;;  %vm83_vm1 = vcmask 1041409   ;;  %vm86_vm2 = vcmask 58368   ;;  %s222_s0 = smov [#allocation5]   ;;  %vm136_vm3 = vcmask 254976  }
  0x10   :  { %v39_v3 = vmul.f32 %v153_v1, %v29_v0  ;;  %v40_v4 = vmul.f32 %v153_v1, %v30_v2  ;;  %v154_v5 = vld [vmem:[%s263_s2] ss:$0 sm:$0xff]  ;;  %v74_v21 = vand.u32 127, %v73_v20  ;;  %v76_v22 = vshrl.u32 %v73_v20, 7  ;;  %s144_s1 = sshll.u32 %s222_s0, 4  ;;  %s145_s1 = int_to_ptr.vmem [resolvable:$true] %s144_s1 }
  0x11   :  { %54 = vbcast.lane.b32.xlu1 %v154_v5, 256  ;;  %s194_s2 = scalar_lea.vmem %s145_s1, 32  ;;  %p199_p6 = scmp.lt.s32.totalorder %s145_s1, %s145_s1 }
  0x12   :  { %v42_v6 = vsel %vm41_vm0, %v39_v3, 0.0  ;;  %v45_v7 = vsel %vm41_vm0, %v40_v4, 0.0  ;;  %v77_v23 = vsub.s32 %v74_v21, %v76_v22  ;;  %v94_v30 = vsub.s32 0, %v76_v22  ;;  %p195_p5 = scmp.ne.s32.totalorder %s145_s1, %s194_s2  ;;  %p200_p7 = scmp.lt.s32.totalorder %s194_s2, %s194_s2 }
  0x13   :  { %43 = vadd.xlane.f32.xlu0 %v42_v6  ;;  %v98_v31 = vsub.s32 1, %v76_v22 }
  0x14   :  { %p201_p8 = por %p200_p7, %p199_p6 }
  0x16   :  { %p202_p9 = pnand %p201_p8, %p195_p5 }
  0x17   :  { %46 = vadd.xlane.f32.xlu0 %v45_v7 }
  0x83   :  { %v55_v9 = vpop.permute.xlu1 %54 }
  0x9c   :  { %v44_v10 = vpop.xlane.xlu0 %43 }
  0x9d   :  { %v57_v11 = vadd.f32 %v55_v9, %v44_v10 }
  0x9f   :  { %162 = vtanh.f32 %v57_v11 }
  0xa0   :  { %v47_v12 = vpop.xlane.xlu0 %46 }
  0xa1   :  { %v58_v13 = vadd.f32 %v55_v9, %v47_v12 }
  0xa3   :  { %164 = vtanh.f32 %v58_v13 }
  0xac   :  { %v163_v14 = vpop.eup %162 }
  0xad   :  { %v61_v15 = vmul.f32 1.442695, %v163_v14 }
  0xaf   :  { %166 = vpow2.f32 %v61_v15 }
  0xb0   :  { %v165_v16 = vpop.eup %164 }
  0xb1   :  { %v63_v17 = vmul.f32 1.442695, %v165_v16 }
  0xb3   :  { %168 = vpow2.f32 %v63_v17 }
  0xbc   :  { %v167_v18 = vpop.eup %166 }
  0xbd   :  { %68 = vperm.xlu1 %160, %v167_v18  }
  0xc0   :  { %v169_v19 = vpop.eup %168 }
  0xc1   :  { %71 = vperm.xlu0 %161, %v169_v19  }
 0x138   :  { %v69_v24 = vpop.permute.xlu1 %68 }
 0x139   :  { %v78_v26 = vrot.slane %v69_v24, %v77_v23 }
 0x13c   :  { %v72_v25 = vpop.permute.xlu0 %71 }
 0x13d   :  { %v82_v27 = vrot.slane %v72_v25, %v77_v23 }
 0x13f   :  { %v84_v28 = vsel %vm83_vm1, %v82_v27, %v78_v26 }
 0x140   :  { %v87_v29 = vsel %vm86_vm2, %v84_v28, 0.0 }
 0x141   :  { %88 = vadd.xlane.f32.xlu1 %v87_v29 }
 0x1ca   :  { %v89_v32 = vpop.xlane.xlu1 %88 }
 0x1cb   :  { %v90_v33 = vadd.f32 1e-07, %v89_v32 }
 0x1cd   :  { %v95_v34 = vrot.slane %v90_v33, %v94_v30  ;;  %v99_v35 = vrot.slane %v90_v33, %v98_v31 }
 0x1cf   :  { %170 = vrcp.f32 %v95_v34 }
 0x1d0   :  { %172 = vrcp.f32 %v99_v35 }
 0x1dc   :  { %v171_v36 = vpop.eup %170 }
 0x1dd   :  { %v173_v37 = vpop.eup %172  ;;  %v103_v38 = vmul.f32 %v171_v36, %v167_v18 }
 0x1de   :  { %v105_v39 = vmul.f32 %v173_v37, %v169_v19 }
 0x1df   :  { %108 = vperm.xlu1 %160, %v103_v38  }
 0x1e0   :  { %113 = vperm.xlu0 %161, %v105_v39  }
 0x25a   :  { %v109_v40 = vpop.permute.xlu1 %108 }
 0x25b   :  { %v114_v41 = vpop.permute.xlu0 %113  ;;  %v116_v42 = vmul.f32 %v109_v40, %v29_v0 }
 0x25c   :  { %v117_v43 = vmul.f32 %v114_v41, %v30_v2 }
 0x25d   :  { %v118_v44 = vsel %vm41_vm0, %v116_v42, 0.0 }
 0x25e   :  { %v125_v45 = vsel %vm41_vm0, %v117_v43, 0.0  ;;  %v119_v46 = vrot.slane %v118_v44, 4 }
 0x25f   :  { %v126_v47 = vrot.slane %v125_v45, 4 }
 0x260   :  { %v120_v48 = vadd.f32 %v119_v46, %v118_v44 }
 0x261   :  { %v127_v49 = vadd.f32 %v126_v47, %v125_v45 }
 0x262   :  { %v121_v50 = vrot.slane %v120_v48, 2 }
 0x263   :  { %v128_v51 = vrot.slane %v127_v49, 2 }
 0x264   :  { %v122_v52 = vadd.f32 %v121_v50, %v120_v48 }
 0x265   :  { %v129_v53 = vadd.f32 %v128_v51, %v127_v49 }
 0x266   :  { %v123_v54 = vrot.slane %v122_v52, 1 }
 0x267   :  { %v130_v55 = vrot.slane %v129_v53, 1 }
 0x268   :  { %v124_v56 = vadd.f32 %v123_v54, %v122_v52 }
 0x269   :  { %v131_v57 = vadd.f32 %v130_v55, %v129_v53 }
 0x26b   :  { %v134_v58 = vsel %vm83_vm1, %v131_v57, %v124_v56 }
 0x26c   :  { %137 = vst.msk [vmem:[#allocation5] sm:$0x3] %vm136_vm3, %v134_v58 }
 0x26d   :  { %205 = shalt.err (!%p202_p9)
}
 0x26e   :  { %147 = dma.vmem_to_hbm [thread:$0]  %s145_s1, 32, %s264_s3, [#allocation4]  }
 0x26f   :  { %216 = dma.done.wait [#allocation4], 32  }
 0x270   :  { %217 = vsyncadd [#allocation4], 4294967264 }
 0x271   :  { %151 = vsyncpa [#allocation3], 1 }
 0x272   :  { %152 = vsyncpa [#allocation4], 1 }

</bundles_post_ra>
